<compile_context>
chip_gen: v7x
topology: tpu7x:2x2x1
jax: 0.10.0
libtpu: 0.0.40
codegen_flags: <defaults>
</compile_context>

<pallas_src>
import functools

import jax
import jax.numpy as jnp
from jax.experimental import pallas as pl
from jax.experimental.pallas import tpu as pltpu


def _round_up(x, m):
    return ((x + m - 1) // m) * m


def _vmem_capacity_bytes():
    """Physical VMEM per core; falls back to a v7x-safe 64 MiB."""
    try:
        cap = getattr(pltpu.get_tpu_info(), "vmem_capacity_bytes", None)
        if cap:
            return int(cap)
    except Exception:
        pass
    return 64 * 1024 * 1024


def _choose_tb(n_rows, n_classes, x_itemsize, t_itemsize, vmem_cap):
    """Pick the batch-tile size (multiple of 8 sublanes)."""
    # Pipeline-buffer + f32-intermediate budget: ~55% of physical VMEM
    # (leaves headroom for compiler scratch).
    budget = (vmem_cap * 11) // 20
    # Per batch-row working set:
    #   2 double-buffered native-dtype HBM tiles (x + target)
    # + ~4 (tb, C) f32 intermediates (x_f32, exp(x-m), nll, t*nll).
    per_row = 2 * n_classes * (x_itemsize + t_itemsize) + 4 * n_classes * 4
    tb_budget = max(8, min((budget // max(per_row, 1)) // 8 * 8, 4096))
    # TODO(synk): for class counts so large that even tb=8 exceeds the budget
    # (~200K+ classes on v7x), add a second "arbitrary" grid axis over the
    # class dim with online max/lse accumulators (flash-softmax style).

    # Cap tb so the parallel grid has several steps (both v7x TensorCores get
    # work, DMA prologue amortized) while keeping input tiles >= ~2 MiB.
    row_stream = n_classes * (x_itemsize + t_itemsize)
    for steps in (8, 2):
        tb_steps = _round_up(pl.cdiv(n_rows, steps), 8)
        if tb_steps * row_stream >= 2 * 1024 * 1024:
            return int(min(tb_budget, tb_steps))
    # Tiny problems: still aim for >=2 grid steps.
    return int(min(tb_budget, max(8, _round_up(pl.cdiv(n_rows, 2), 8))))


def _soft_ce_kernel(x_ref, t_ref, o_ref, *, n_rows, tb):
    # x_ref / t_ref: (tb, C) tiles at native dtype; o_ref: (tb, 1) f32 losses.
    x = x_ref[...].astype(jnp.float32)

    # Numerically stable -log_softmax pieces along the lane (class) axis.
    m = jnp.max(x, axis=-1, keepdims=True)                          # (tb, 1)
    lse = jnp.log(jnp.sum(jnp.exp(x - m), axis=-1, keepdims=True))  # (tb, 1)
    nll = (m + lse) - x                                             # (tb, C)

    # Elementwise (well-conditioned) soft cross-entropy per row.
    loss = jnp.sum(t_ref[...].astype(jnp.float32) * nll,
                   axis=-1, keepdims=True)                          # (tb, 1)

    # Mask the ragged batch tail: rows >= n_rows hold stale VMEM data.
    row = (pl.program_id(0) * tb
           + jax.lax.broadcasted_iota(jnp.int32, (tb, 1), 0))
    o_ref[...] = jnp.where(row < n_rows, loss, 0.0)


@jax.jit
def soft_target_cross_entropy(x, target):
    """x, target: (N, C) arrays (f32 / bf16). Returns scalar f32 mean loss."""
    N, C = x.shape
    x_bytes = jnp.dtype(x.dtype).itemsize
    t_bytes = jnp.dtype(target.dtype).itemsize

    vmem_cap = _vmem_capacity_bytes()
    tb = _choose_tb(N, C, x_bytes, t_bytes, vmem_cap)
    grid = pl.cdiv(N, tb)
    # Output rows rounded to a multiple of 8 sublanes (fresh allocation only —
    # inputs are streamed unpadded; masked tail rows are written as exactly 0).
    Np8 = _round_up(N, 8)

    kernel = functools.partial(_soft_ce_kernel, n_rows=N, tb=tb)

    cost = pl.CostEstimate(
        flops=6 * N * C,
        transcendentals=N * C + N,
        bytes_accessed=N * C * (x_bytes + t_bytes) + 4 * Np8,
    )

    per_row = pl.pallas_call(
        kernel,
        out_shape=jax.ShapeDtypeStruct((Np8, 1), jnp.float32),
        grid_spec=pltpu.PrefetchScalarGridSpec(
            num_scalar_prefetch=0,
            grid=(grid,),
            in_specs=[
                pl.BlockSpec((tb, C), lambda i: (i, 0)),
                pl.BlockSpec((tb, C), lambda i: (i, 0)),
            ],
            out_specs=pl.BlockSpec((tb, 1), lambda i: (i, 0)),
        ),
        compiler_params=pltpu.CompilerParams(
            # No carried state -> fully parallel grid (both TCs on v7x).
            dimension_semantics=("parallel",),
            vmem_limit_bytes=(vmem_cap * 3) // 4,
        ),
        cost_estimate=cost,
    )(x, target)

    # Final reduction + mean over the true batch (masked rows are exactly 0).
    return jnp.sum(per_row) / N


def _reference(x, target):
    logp = jax.nn.log_softmax(x.astype(jnp.float32), axis=-1)
    return jnp.mean(jnp.sum(-target.astype(jnp.float32) * logp, axis=-1))


if __name__ == "__main__":
    key = jax.random.PRNGKey(0)
    k1, k2, k3, k4, k5, k6 = jax.random.split(key, 6)

    # Case 1: "nice" shapes (batch=16, classes=32).
    N, C = 16, 32
    x = jax.random.normal(k1, (N, C), dtype=jnp.float32)
    target = jax.nn.softmax(jax.random.normal(k2, (N, C), dtype=jnp.float32), axis=-1)
    loss = jax.block_until_ready(soft_target_cross_entropy(x, target))
    ref = _reference(x, target)
    assert jnp.allclose(loss, ref, atol=1e-4, rtol=1e-4), (loss, ref)

    # Case 2: ragged shapes (batch=10, classes=50) — unpadded lane / tail-mask path.
    N2, C2 = 10, 50
    x2 = jax.random.normal(k3, (N2, C2), dtype=jnp.float32)
    target2 = jax.nn.softmax(jax.random.normal(k4, (N2, C2), dtype=jnp.float32), axis=-1)
    loss2 = jax.block_until_ready(soft_target_cross_entropy(x2, target2))
    ref2 = _reference(x2, target2)
    assert jnp.allclose(loss2, ref2, atol=1e-4, rtol=1e-4), (loss2, ref2)

    # Case 3: bf16 inputs stream at half the HBM bytes; compute stays f32.
    N3, C3 = 24, 40
    x3 = jax.random.normal(k5, (N3, C3), dtype=jnp.bfloat16)
    target3 = jax.nn.softmax(
        jax.random.normal(k6, (N3, C3), dtype=jnp.float32), axis=-1
    ).astype(jnp.bfloat16)
    loss3 = jax.block_until_ready(soft_target_cross_entropy(x3, target3))
    ref3 = _reference(x3, target3)
    assert jnp.allclose(loss3, ref3, atol=2e-2, rtol=2e-2), (loss3, ref3)

    print("KERNEL_OK")
</pallas_src>

<mosaic_0001>
module attributes {stable_mosaic.version = 11 : i64} {
  func.func @_soft_ce_kernel(%arg0: i32, %arg1: memref<8x32xf32, #tpu.memory_space<vmem>>, %arg2: memref<8x32xf32, #tpu.memory_space<vmem>>, %arg3: memref<8x1xf32, #tpu.memory_space<vmem>>) attributes {dimension_semantics = [#tpu.dimension_semantics<parallel>], iteration_bounds = array<i64: 2>, scalar_prefetch = 0 : i64, scratch_operands = 0 : i64, tpu.core_type = #tpu.core_type<tc>, window_params = [{transform_indices = @transform_0, window_bounds = array<i64: 8, 32>}, {transform_indices = @transform_1, window_bounds = array<i64: 8, 32>}, {transform_indices = @transform_2, window_bounds = array<i64: 8, 1>}]} {
    %c0 = arith.constant 0 : index
    %c0_0 = arith.constant 0 : index
    %0 = vector.load %arg1[%c0, %c0_0] : memref<8x32xf32, #tpu.memory_space<vmem>>, vector<8x32xf32>
    %cst = arith.constant dense<0xFF800000> : vector<8xf32>
    %1 = vector.multi_reduction <maximumf>, %0, %cst [1] : vector<8x32xf32> to vector<8xf32>
    %2 = vector.shape_cast %1 : vector<8xf32> to vector<8x1xf32>
    %3 = vector.broadcast %2 : vector<8x1xf32> to vector<8x32xf32>
    %4 = arith.subf %0, %3 : vector<8x32xf32>
    %5 = math.exp %4 : vector<8x32xf32>
    %cst_1 = arith.constant dense<0.000000e+00> : vector<8xf32>
    %6 = vector.multi_reduction <add>, %5, %cst_1 [1] : vector<8x32xf32> to vector<8xf32>
    %7 = vector.shape_cast %6 : vector<8xf32> to vector<8x1xf32>
    %8 = math.log %7 : vector<8x1xf32>
    %9 = arith.addf %2, %8 : vector<8x1xf32>
    %10 = vector.broadcast %9 : vector<8x1xf32> to vector<8x32xf32>
    %11 = arith.subf %10, %0 : vector<8x32xf32>
    %c0_2 = arith.constant 0 : index
    %c0_3 = arith.constant 0 : index
    %12 = vector.load %arg2[%c0_2, %c0_3] : memref<8x32xf32, #tpu.memory_space<vmem>>, vector<8x32xf32>
    %13 = arith.mulf %12, %11 : vector<8x32xf32>
    %cst_4 = arith.constant dense<0.000000e+00> : vector<8xf32>
    %14 = vector.multi_reduction <add>, %13, %cst_4 [1] : vector<8x32xf32> to vector<8xf32>
    %15 = vector.shape_cast %14 : vector<8xf32> to vector<8x1xf32>
    %c8_i32 = arith.constant 8 : i32
    %16 = arith.muli %arg0, %c8_i32 : i32
    %17 = tpu.iota {dimensions = array<i32: 0>} : vector<8x1xi32>
    %18 = vector.broadcast %16 : i32 to vector<8x1xi32>
    %19 = arith.addi %18, %17 : vector<8x1xi32>
    %c16_i32 = arith.constant 16 : i32
    %20 = vector.broadcast %c16_i32 : i32 to vector<8x1xi32>
    %21 = arith.cmpi slt, %19, %20 : vector<8x1xi32>
    %cst_5 = arith.constant 0.000000e+00 : f32
    %22 = vector.broadcast %cst_5 : f32 to vector<8x1xf32>
    %23 = arith.select %21, %15, %22 : vector<8x1xi1>, vector<8x1xf32>
    %c0_6 = arith.constant 0 : index
    %c0_7 = arith.constant 0 : index
    %24 = vector.load %arg3[%c0_6, %c0_7] : memref<8x1xf32, #tpu.memory_space<vmem>>, vector<8x1xf32>
    tpu.vector_store %arg3[%c0_6, %c0_7], %23 {strides = array<i32>} : memref<8x1xf32, #tpu.memory_space<vmem>>, vector<8x1xf32>,
    return
  }
  func.func @transform_0(%arg0: i32) -> (i32, i32) {
    %c0_i32 = arith.constant 0 : i32
    %c0_i32_0 = arith.constant 0 : i32
    return %arg0, %c0_i32 : i32, i32
  }
  func.func @transform_1(%arg0: i32) -> (i32, i32) {
    %c0_i32 = arith.constant 0 : i32
    %c0_i32_0 = arith.constant 0 : i32
    return %arg0, %c0_i32 : i32, i32
  }
  func.func @transform_2(%arg0: i32) -> (i32, i32) {
    %c0_i32 = arith.constant 0 : i32
    %c0_i32_0 = arith.constant 0 : i32
    return %arg0, %c0_i32 : i32, i32
  }
}

</mosaic_0001>

<bundles_post_ra>
// kernel: soft_target_cross_entropy.1
= control target key start
LH: loop header
LB: loop body
LE: loop exit
PB: predicated region body
PF: predicated region fallthrough
CT: control target
= control target key end

     0   :  { %7 = vsyncpa [#allocation3], 0  ;;  %s650_s0 = inlined_call_operand.hbm [shape: f32[16,32], index: 0, kind: input, shape index: {}]   ;;  %s651_s1 = inlined_call_operand.hbm [shape: f32[16,32], index: 1, kind: input, shape index: {}]   ;;  %s652_s2 = inlined_call_operand.vmem [shape: f32[16,1], index: 2, kind: output, shape index: {}]  }
   0x1   :  { %9 = vsyncpa [#allocation3 + $0x1], 0 }
   0x2   :  { %10 = vsyncpa [#allocation5], 0 }
   0x3   :  { %12 = vsyncpa [#allocation5 + $0x1], 0  ;;  %s492_s9 = smov 0   ;;  %s494_s10 = smov 0  }
   0x4   :  { %s496_s11 = smov 0   ;;  %s498_s12 = smov 0  }
   0x5 LB: > { %s511_s13 = sadd.s32 4294967295, %s473_s12   ;;  %s514_s14 = sadd.s32 1, %s473_s12   ;;  %s473_s12 = sphi %s498_s12, %s664_s12   ;;  %s469_s11 = sphi %s496_s11, %s663_s11   ;;  %s465_s10 = sphi %s494_s10, %s662_s10   ;;  %s461_s9 = sphi %s492_s9, %s661_s9  }
   0x6   : > { %s22_s15 = ssub.s32 %s473_s12, %s514_s14  ;;  %s25_s16 = sadd.s32 1, %s469_s11 }
   0x7   : > { %p23_p0 = scmp.eq.s32.totalorder %s22_s15, 0  ;;  %p32_p1 = scmp.ne.s32.totalorder %s469_s11, %s465_s10 }
   0x8   : > { %p33_p2 = scmp.eq.s32.totalorder %s473_s12, 0  ;;  %p38_p3 = scmp.ne.s32.totalorder %s465_s10, %s461_s9 }
   0x9   : > { %s524_s17 = scalar_select %p23_p0, %s469_s11, %s25_s16  }
   0xa   : > { %p34_p4 = por %p33_p2, %p32_p1  ;;  %p39_p5 = scmp.eq.s32.totalorder %s511_s13, 0 }
   0xb   : > { %p338_p6 = scmp.lt.s32.totalorder %s473_s12, 2  ;;  %s533_s19 = sand.u32 1, %s469_s11  }
   0xc   : > { %p528_p7 = por %p39_p5, %p38_p3  ;;  %s316_s20 = sshll.u32 %s533_s19, 3 }
   0xd   : > { %s317_s21 = sshll.u32 %s473_s12, 7  ;;  %s118_s25 = scalar_lea.vmem [#allocation2], %s316_s20 }
   0xe   : > { %s654_s18 = scalar_select %p528_p7, 1, 0 }
   0xf   : > { %s542_s24 = scalar_lea.hbm %s650_s0, %s317_s21  ;;  %s125_s26 = sshll.u32 %s118_s25, 4  ;;  %s546_s26 = int_to_ptr.vmem [resolvable:$true] %s125_s26 }
  0x10   : > { %p548_p8 = pnand %p338_p6, %p34_p4  ;;  %s115_s28 = scalar_lea.sflag [#allocation3], %s533_s19 }
  0x11   : > { %s375_s29 = scalar_lea.hbm %s542_s24, 128  ;;  %s380_s4 = scalar_lea.hbm %s650_s0, 256 }
  0x12   : > { %p376_p11 = scmp.ne.s32.totalorder %s542_s24, %s375_s29  ;;  %p377_p12 = pneg %p548_p8 }
  0x13   : > { %p381_p1 = scmp.lt.u32.totalorder %s542_s24, %s650_s0  ;;  %p382_p2 = scmp.lt.u32.totalorder %s380_s4, %s375_s29 }
  0x14   : > { %p378_p13 = pnand %p377_p12, %p376_p11  ;;  %p384_p4 = scmp.lt.u32.totalorder %s375_s29, %s542_s24 }
  0x15   : > { %p383_p3 = por %p382_p2, %p381_p1 }
  0x16   : > { %p379_p0 = pneg %p378_p13 }
  0x17   : > { %p385_p5 = por %p384_p4, %p383_p3 }
  0x19   : > { %p386_p6 = pnand %p385_p5, %p379_p0 }
  0x1b   : > { %389 = shalt.err (!%p386_p6)
}
  0x1c   : > { %s390_s7 = scalar_lea.vmem %s546_s26, 128  ;;  %s475_s8 = smov [#allocation2]  }
  0x1d   : > { %p391_p11 = scmp.ne.s32.totalorder %s546_s26, %s390_s7  ;;  %s395_s9 = sshll.u32 %s475_s8, 4  ;;  %s396_s9 = int_to_ptr.vmem [resolvable:$false] %s395_s9 }
  0x1e   : > { %s397_s15 = scalar_lea.vmem %s396_s9, 256  ;;  %p398_p10 = scmp.lt.s32.totalorder %s546_s26, %s396_s9 }
  0x1f   : > { %p393_p13 = pnand %p391_p11, %p377_p12  ;;  %p399_p1 = scmp.lt.s32.totalorder %s397_s15, %s390_s7 }
  0x21   : > { %p394_p9 = pneg %p393_p13  ;;  %p400_p2 = por %p399_p1, %p398_p10 }
  0x23   : > { %p401_p3 = pnand %p400_p2, %p394_p9 }
  0x25   : > { %404 = shalt.err (!%p401_p3)
}
  0x26   : > { %334 = dma.hbm_to_vmem [thread:$0]  (!%p548_p8), %s542_s24, 128, %s546_s26, %s115_s28  }
  0x27   : > { %p656_p0 = scmp.lt.s32.totalorder %s473_s12, 3  ;;  %p657_p4 = scmp.ge.s32.totalorder %s473_s12, 1 }
  0x28   : > { %s593_s25 = scalar_lea.hbm %s651_s1, %s317_s21  ;;  %s136_s29 = scalar_lea.vmem [#allocation4], %s316_s20 }
  0x29   : > { %p584_p5 = pnand %p657_p4, %p656_p0  ;;  %s143_s30 = sshll.u32 %s136_s29, 4  ;;  %s144_s30 = int_to_ptr.vmem [resolvable:$true] %s143_s30 }
  0x2a   : > { %s133_s24 = scalar_lea.sflag [#allocation5], %s533_s19  ;;  %s405_s26 = scalar_lea.hbm %s593_s25, 128 }
  0x2b   : > { %s658_s16 = scalar_select %p584_p5, 1, 0 }
  0x2c   : > { %p406_p9 = scmp.ne.s32.totalorder %s593_s25, %s405_s26  ;;  %s410_s21 = scalar_lea.hbm %s651_s1, 256 }
  0x2d   : > { %p411_p11 = scmp.lt.u32.totalorder %s593_s25, %s651_s1  ;;  %p412_p13 = scmp.lt.u32.totalorder %s410_s21, %s405_s26 }
  0x2e   : > { %p408_p10 = pnand %p406_p9, %p377_p12  ;;  %p414_p2 = scmp.lt.u32.totalorder %s405_s26, %s593_s25 }
  0x2f   : > { %p413_p1 = por %p412_p13, %p411_p11 }
  0x30   : > { %p409_p6 = pneg %p408_p10 }
  0x31   : > { %p415_p3 = por %p414_p2, %p413_p1 }
  0x33   : > { %p416_p0 = pnand %p415_p3, %p409_p6 }
  0x35   : > { %419 = shalt.err (!%p416_p0)
}
  0x36   : > { %s420_s19 = scalar_lea.vmem %s144_s30, 128  ;;  %s476_s20 = smov [#allocation4]  }
  0x37   : > { %p421_p4 = scmp.ne.s32.totalorder %s144_s30, %s420_s19  ;;  %s425_s5 = sshll.u32 %s476_s20, 4  ;;  %s426_s5 = int_to_ptr.vmem [resolvable:$false] %s425_s5 }
  0x38   : > { %s427_s6 = scalar_lea.vmem %s426_s5, 256  ;;  %p428_p7 = scmp.lt.s32.totalorder %s144_s30, %s426_s5 }
  0x39   : > { %p423_p9 = pnand %p421_p4, %p377_p12  ;;  %p429_p5 = scmp.lt.s32.totalorder %s427_s6, %s420_s19 }
  0x3b   : > { %p424_p10 = pneg %p423_p9  ;;  %p430_p11 = por %p429_p5, %p428_p7 }
  0x3d   : > { %p431_p13 = pnand %p430_p11, %p424_p10 }
  0x3f   : > { %434 = shalt.err (!%p431_p13)
}
  0x40   : > { %337 = dma.hbm_to_vmem [thread:$0]  (!%p548_p8), %s593_s25, 128, %s144_s30, %s133_s24  }
  0x41   : > { %p659_p6 = scmp.ne.s32.totalorder %s658_s16, 0 }
  0x42   : > { %s154_s7 = sand.u32 (!%p659_p6), 1, %s465_s10   ;;  %p660_p12 = scmp.ne.s32.totalorder (!%p659_p6), %s654_s18, 0 }
  0x43   : > { %152 = sbr.rel (%p659_p6) target bundleno = 543 (0x21f), region = 28  ;;  %s321_s8 = sshll.u32 (!%p659_p6), %s154_s7, 3 }
  0x44   : > { %s155_s9 = scalar_lea.sflag (!%p659_p6), [#allocation3], %s154_s7  ;;  %s158_s15 = scalar_lea.vmem (!%p659_p6), [#allocation2], %s321_s8 }
  0x4a   : > { %452 = dma.done.wait (%p660_p12), %s155_s9, 128  }
  0x4b   : > { %454 = vsyncadd (%p660_p12), %s155_s9, 4294967168  ;;  %s164_s22 = scalar_lea.sflag [#allocation5], %s154_s7  ;;  %s167_s23 = scalar_lea.vmem [#allocation4], %s321_s8 }
  0x4c   : > { %456 = dma.done.wait (%p660_p12), %s164_s22, 128  }
  0x4d   : > { %458 = vsyncadd (%p660_p12), %s164_s22, 4294967168  ;;  %vm197_vm0 = vcmask 261120   ;;  %v196_v0 = vld [vmem:[%s158_s15] sm:$0xff]  ;;  %v211_v11 = vld [vmem:[%s167_s23] sm:$0xff]  ;;  %v217_v15 = vlaneseq  ;;  %p192_p7 = scmp.lt.s32.totalorder %s511_s13, 1  ;;  %s324_s18 = sshll.u32 %s511_s13, 3 }
  0x4e   : > { %v198_v1 = vsel %vm197_vm0, %v196_v0, -inf  ;;  %v219_v17 = vstv %s324_s18  ;;  %vm223_vm2 = vcmask 7168  }
  0x4f   : > { %199 = vmax.xlane.f32.xlu0 %v198_v1  ;;  %v218_v16 = vshrl.u32 %v217_v15, 7  ;;  %s666_s13 = smov (!%p192_p7, %s511_s13), 1 }
  0x50   : > { %s323_s27 = sshll.u32 %s666_s13, 3 }
  0x51   : > { %v220_v18 = vadd.s32 %v219_v17, %v218_v16  ;;  %s195_s29 = scalar_lea.vmem %s652_s2, %s323_s27 }
  0x53   : > { %vm221_vm1 = vcmp.lt.s32.totalorder %v220_v18, 16 }
  0xdc   : > { %v200_v2 = vpop.xlane.xlu0 %199 }
  0xdd   : > { %v201_v3 = vsub.f32 %v196_v0, %v200_v2 }
  0xdf   : > { %v202_v4 = vmul.f32 1.442695, %v201_v3 }
  0xe1   : > { %371 = vpow2.f32 %v202_v4 }
  0xeb   : > { %v372_v5 = vpop.eup %371 }
  0xec   : > { %v204_v6 = vsel %vm197_vm0, %v372_v5, 0.0 }
  0xed   : > { %205 = vadd.xlane.f32.xlu0 %v204_v6 }
 0x17a   : > { %v206_v7 = vpop.xlane.xlu0 %205 }
 0x17b   : > { %373 = vlog2.f32 %v206_v7 }
 0x185   : > { %v374_v8 = vpop.eup %373 }
 0x186   : > { %v208_v9 = vmul.f32 0.6931472, %v374_v8 }
 0x188   : > { %v209_v10 = vadd.f32 %v208_v9, %v200_v2 }
 0x18a   : > { %v210_v12 = vsub.f32 %v209_v10, %v196_v0 }
 0x18c   : > { %v212_v13 = vmul.f32 %v211_v11, %v210_v12 }
 0x18e   : > { %v213_v14 = vsel %vm197_vm0, %v212_v13, 0.0 }
 0x18f   : > { %214 = vadd.xlane.f32.xlu1 %v213_v14 }
 0x21c   : > { %v215_v19 = vpop.xlane.xlu1 %214 }
 0x21d   : > { %v222_v20 = vsel %vm221_vm1, %v215_v19, 0.0 }
 0x21e   : > { %224 = vst.msk [vmem:[%s195_s29] sm:$0xff] %vm223_vm2, %v222_v20 }
 0x21f PF: > { %p15_p8 = scmp.ge.s32.totalorder %s514_s14, 4   ;;  %s661_s9 = smov %s465_s10 }
 0x220   : > { %s662_s10 = smov %s469_s11  ;;  %s663_s11 = smov %s524_s17 }
 0x221   : > { %s664_s12 = smov %s514_s14  ;;  %17 = sbr.rel (!%p15_p8) target bundleno = 5 (0x5), region = 81 }
 0x228   :  { %244 = vsyncpa [#allocation3], 1 }
 0x229   :  { %246 = vsyncpa [#allocation3 + $0x1], 1 }
 0x22a   :  { %247 = vsyncpa [#allocation5], 1 }
 0x22b   :  { %249 = vsyncpa [#allocation5 + $0x1], 1 }

</bundles_post_ra>
